<compile_context>
chip_gen: v6e
topology: v6e:2x2x1
jax: 0.10.0
libtpu: 0.0.40
codegen_flags: <defaults>
</compile_context>

<pallas_src>
import jax
import jax.numpy as jnp
from jax.experimental import pallas as pl
from jax.experimental.pallas import tpu as pltpu

LANE = 128
SUBLANE = 8
# Below this per-TensorCore row count, splitting a single tile in two (for the
# v7x megacore) is not worth the extra grid step on single-core chips.
_MIN_SPLIT_ROWS = 256


def _round_up(n, m):
    return ((n + m - 1) // m) * m


def _cdiv(a, b):
    return (a + b - 1) // b


def qnetwork_kernel(x_ref, w1_ref, b1_ref, w2_ref, b2_ref, w3_ref, b3_ref,
                    out_ref):
    """Fused 3-layer MLP on one batch tile: relu(relu(x@W1+b1)@W2+b2)@W3+b3."""
    x = x_ref[...]                       # (TB, S), S is tiny (2 for MountainCar)
    w1 = w1_ref[...]                     # (S, Hp), Hp = 128 (lane-dense)
    tb = x.shape[0]
    hp = w1.shape[1]

    # fc1: contraction dim K = S = 2 -> VPU broadcast FMAs (statically
    # unrolled) instead of paying an MXU round trip for ~2 MACs per output.
    h1 = jnp.broadcast_to(b1_ref[...], (tb, hp))
    for k in range(x.shape[1]):
        h1 = h1 + x[:, k:k + 1] * w1[k:k + 1, :]
    h1 = jnp.maximum(h1, 0.0)

    # fc2 on the MXU, f32 accumulation; (tb,128)x(128,128) full lane-dense tile.
    h2 = jnp.dot(h1, w2_ref[...], preferred_element_type=jnp.float32)
    h2 = jnp.maximum(h2 + b2_ref[...], 0.0)

    # fc3 on the MXU; result stays a lane-dense (tb, 128) register tile ...
    q = jnp.dot(h2, w3_ref[...], preferred_element_type=jnp.float32)
    q = q + b3_ref[...]

    # ... but only the real action columns are written back to HBM, so the
    # output stream is (batch, action_size) instead of a 128-wide padded slab.
    a = out_ref.shape[1]
    out_ref[...] = q[:, :a].astype(out_ref.dtype)


def qnetwork_forward(x, params, *, block_batch=1024):
    """x: [batch, state_size] float32. Returns Q-values [batch, action_size]."""
    w1, b1, w2, b2, w3, b3 = params
    batch, state_size = x.shape
    hidden = w1.shape[1]
    action_size = w3.shape[1]

    # Lane-dense compute width: pad hidden (64 -> 128) and the fc3 compute
    # width (3 -> 128). Padded rows/cols are zero, so they contribute nothing.
    hidden_pad = _round_up(hidden, LANE)
    out_pad = _round_up(max(action_size, LANE), LANE)

    w1p = jnp.zeros((state_size, hidden_pad), w1.dtype).at[:, :hidden].set(w1)
    b1p = jnp.zeros((1, hidden_pad), b1.dtype).at[:, :hidden].set(b1)
    w2p = jnp.zeros((hidden_pad, hidden_pad), w2.dtype).at[:hidden, :hidden].set(w2)
    b2p = jnp.zeros((1, hidden_pad), b2.dtype).at[:, :hidden].set(b2)
    w3p = jnp.zeros((hidden_pad, out_pad), w3.dtype).at[:hidden, :action_size].set(w3)
    b3p = jnp.zeros((1, out_pad), b3.dtype).at[:, :action_size].set(b3)

    # Adaptive batch tiling: just enough tiles to keep each tile <= block_batch,
    # then split once more (when there is enough work) so v7x's two TensorCores
    # both get a tile via the "parallel" grid axis. No near-empty tiles.
    padded = _round_up(batch, SUBLANE)
    ntiles = max(1, _cdiv(padded, block_batch))
    if ntiles == 1 and padded >= 2 * _MIN_SPLIT_ROWS:
        ntiles = 2
    tb = _round_up(_cdiv(padded, ntiles), SUBLANE)
    padded_batch = tb * ntiles
    if padded_batch != batch:
        x = jnp.pad(x, ((0, padded_batch - batch), (0, 0)))

    grid = (ntiles,)

    # Advisory cost hint: actual HBM traffic (input + params + slim output) and
    # the padded compute, both using padded_batch consistently.
    flops = 2 * padded_batch * (state_size * hidden_pad
                                + hidden_pad * hidden_pad
                                + hidden_pad * out_pad)
    param_elems = (w1p.size + b1p.size + w2p.size + b2p.size
                   + w3p.size + b3p.size)
    bytes_accessed = 4 * (padded_batch * state_size + param_elems
                          + padded_batch * action_size)

    out = pl.pallas_call(
        qnetwork_kernel,
        out_shape=jax.ShapeDtypeStruct((padded_batch, action_size), jnp.float32),
        grid=grid,
        in_specs=[
            pl.BlockSpec((tb, state_size), lambda i: (i, 0)),       # x batch tile
            # Constant index_maps: parameters are revisit-constant blocks,
            # DMA'd once and VMEM-resident across all grid steps.
            pl.BlockSpec((state_size, hidden_pad), lambda i: (0, 0)),  # w1
            pl.BlockSpec((1, hidden_pad), lambda i: (0, 0)),           # b1
            pl.BlockSpec((hidden_pad, hidden_pad), lambda i: (0, 0)),  # w2
            pl.BlockSpec((1, hidden_pad), lambda i: (0, 0)),           # b2
            pl.BlockSpec((hidden_pad, out_pad), lambda i: (0, 0)),     # w3
            pl.BlockSpec((1, out_pad), lambda i: (0, 0)),              # b3
        ],
        out_specs=pl.BlockSpec((tb, action_size), lambda i: (i, 0)),
        compiler_params=pltpu.CompilerParams(
            dimension_semantics=("parallel",)),   # shards batch across v7x's 2 TCs
        cost_estimate=pl.CostEstimate(
            flops=flops, transcendentals=0, bytes_accessed=bytes_accessed),
    )(x, w1p, b1p, w2p, b2p, w3p, b3p)

    return out[:batch]


def init_qnetwork_params(key, state_size, action_size, hidden_size=64):
    """Init mimicking nn.Linear's U(-1/sqrt(fan_in), +1/sqrt(fan_in)).

    Weights are stored as [in_features, out_features]; biases as (1, out).
    """
    def linear(k, fan_in, fan_out):
        kw, kb = jax.random.split(k)
        bound = 1.0 / jnp.sqrt(jnp.float32(fan_in))
        w = jax.random.uniform(kw, (fan_in, fan_out), jnp.float32, -bound, bound)
        b = jax.random.uniform(kb, (1, fan_out), jnp.float32, -bound, bound)
        return w, b

    k1, k2, k3 = jax.random.split(key, 3)
    w1, b1 = linear(k1, state_size, hidden_size)
    w2, b2 = linear(k2, hidden_size, hidden_size)
    w3, b3 = linear(k3, hidden_size, action_size)
    return (w1, b1, w2, b2, w3, b3)


def qnetwork_reference(x, params):
    """Plain-JAX reference for correctness check."""
    w1, b1, w2, b2, w3, b3 = params
    hi = jax.lax.Precision.HIGHEST
    h1 = jnp.maximum(jnp.dot(x, w1, precision=hi) + b1, 0.0)
    h2 = jnp.maximum(jnp.dot(h1, w2, precision=hi) + b2, 0.0)
    return jnp.dot(h2, w3, precision=hi) + b3


if __name__ == "__main__":
    # MountainCar-v0: observation dim = 2, action dim = 3.
    STATE_SIZE = 2
    ACTION_SIZE = 3
    HIDDEN = 64

    key = jax.random.PRNGKey(0)
    k_params, k1, k2, k3 = jax.random.split(key, 4)
    params = init_qnetwork_params(k_params, STATE_SIZE, ACTION_SIZE, HIDDEN)

    # 1) Small inference-style batch (single tile, single grid step).
    #    NOTE: this path is dispatch/DMA-overhead bound; kernel tuning can't
    #    move it — batch states per call for the hot action-selection loop.
    x_small = jax.random.normal(k1, (8, STATE_SIZE), jnp.float32)
    q_small = jax.block_until_ready(qnetwork_forward(x_small, params))
    assert q_small.shape == (8, ACTION_SIZE)
    assert jnp.allclose(q_small, qnetwork_reference(x_small, params),
                        atol=1e-4, rtol=1e-4), "mismatch (small batch)"

    # 2) Replay-buffer-style batch: now a single 304-row tile (previously
    #    padded to 512 rows across 2 tiles).
    x_replay = jax.random.normal(k2, (300, STATE_SIZE), jnp.float32)
    q_replay = jax.block_until_ready(qnetwork_forward(x_replay, params))
    assert q_replay.shape == (300, ACTION_SIZE)
    assert jnp.allclose(q_replay, qnetwork_reference(x_replay, params),
                        atol=1e-4, rtol=1e-4), "mismatch (replay batch)"

    # 3) Force the multi-tile path (3 grid steps + row padding) with a small
    #    block_batch to exercise VMEM-resident weights across grid steps.
    x_multi = jax.random.normal(k3, (300, STATE_SIZE), jnp.float32)
    q_multi = jax.block_until_ready(
        qnetwork_forward(x_multi, params, block_batch=128))
    assert q_multi.shape == (300, ACTION_SIZE)
    assert jnp.allclose(q_multi, qnetwork_reference(x_multi, params),
                        atol=1e-4, rtol=1e-4), "mismatch (multi-tile batch)"

    # 4) Batch big enough to trigger the >=2-tile split (v7x megacore path).
    x_split = jax.random.normal(k1, (600, STATE_SIZE), jnp.float32)
    q_split = jax.block_until_ready(qnetwork_forward(x_split, params))
    assert q_split.shape == (600, ACTION_SIZE)
    assert jnp.allclose(q_split, qnetwork_reference(x_split, params),
                        atol=1e-4, rtol=1e-4), "mismatch (split batch)"

    print("KERNEL_OK")
</pallas_src>

<mosaic_0001>
module attributes {stable_mosaic.version = 11 : i64} {
  func.func @qnetwork_kernel(%arg0: i32, %arg1: memref<8x2xf32, #tpu.memory_space<vmem>>, %arg2: memref<2x128xf32, #tpu.memory_space<vmem>>, %arg3: memref<1x128xf32, #tpu.memory_space<vmem>>, %arg4: memref<128x128xf32, #tpu.memory_space<vmem>>, %arg5: memref<1x128xf32, #tpu.memory_space<vmem>>, %arg6: memref<128x128xf32, #tpu.memory_space<vmem>>, %arg7: memref<1x128xf32, #tpu.memory_space<vmem>>, %arg8: memref<8x3xf32, #tpu.memory_space<vmem>>) attributes {dimension_semantics = [#tpu.dimension_semantics<parallel>], iteration_bounds = array<i64: 1>, scalar_prefetch = 0 : i64, scratch_operands = 0 : i64, tpu.core_type = #tpu.core_type<tc>, window_params = [{transform_indices = @transform_0, window_bounds = array<i64: 8, 2>}, {pipeline_mode = #tpu.pipeline_mode<synchronous>, transform_indices = @transform_1, window_bounds = array<i64: 2, 128>}, {pipeline_mode = #tpu.pipeline_mode<synchronous>, transform_indices = @transform_2, window_bounds = array<i64: 1, 128>}, {pipeline_mode = #tpu.pipeline_mode<synchronous>, transform_indices = @transform_3, window_bounds = array<i64: 128, 128>}, {pipeline_mode = #tpu.pipeline_mode<synchronous>, transform_indices = @transform_4, window_bounds = array<i64: 1, 128>}, {pipeline_mode = #tpu.pipeline_mode<synchronous>, transform_indices = @transform_5, window_bounds = array<i64: 128, 128>}, {pipeline_mode = #tpu.pipeline_mode<synchronous>, transform_indices = @transform_6, window_bounds = array<i64: 1, 128>}, {transform_indices = @transform_7, window_bounds = array<i64: 8, 3>}]} {
    %c0 = arith.constant 0 : index
    %c0_0 = arith.constant 0 : index
    %0 = vector.load %arg1[%c0, %c0_0] : memref<8x2xf32, #tpu.memory_space<vmem>>, vector<8x2xf32>
    %c0_1 = arith.constant 0 : index
    %c0_2 = arith.constant 0 : index
    %1 = vector.load %arg2[%c0_1, %c0_2] : memref<2x128xf32, #tpu.memory_space<vmem>>, vector<2x128xf32>
    %c0_3 = arith.constant 0 : index
    %c0_4 = arith.constant 0 : index
    %2 = vector.load %arg3[%c0_3, %c0_4] : memref<1x128xf32, #tpu.memory_space<vmem>>, vector<1x128xf32>
    %3 = vector.shape_cast %2 : vector<1x128xf32> to vector<1x128xf32>
    %4 = vector.broadcast %3 : vector<1x128xf32> to vector<8x128xf32>
    %5 = vector.extract_strided_slice %0 {offsets = [0, 0], sizes = [8, 1], strides = [1, 1]} : vector<8x2xf32> to vector<8x1xf32>
    %6 = vector.extract_strided_slice %1 {offsets = [0, 0], sizes = [1, 128], strides = [1, 1]} : vector<2x128xf32> to vector<1x128xf32>
    %7 = vector.broadcast %5 : vector<8x1xf32> to vector<8x128xf32>
    %8 = vector.broadcast %6 : vector<1x128xf32> to vector<8x128xf32>
    %9 = arith.mulf %7, %8 : vector<8x128xf32>
    %10 = arith.addf %4, %9 : vector<8x128xf32>
    %11 = vector.extract_strided_slice %0 {offsets = [0, 1], sizes = [8, 1], strides = [1, 1]} : vector<8x2xf32> to vector<8x1xf32>
    %12 = vector.extract_strided_slice %1 {offsets = [1, 0], sizes = [1, 128], strides = [1, 1]} : vector<2x128xf32> to vector<1x128xf32>
    %13 = vector.broadcast %11 : vector<8x1xf32> to vector<8x128xf32>
    %14 = vector.broadcast %12 : vector<1x128xf32> to vector<8x128xf32>
    %15 = arith.mulf %13, %14 : vector<8x128xf32>
    %16 = arith.addf %10, %15 : vector<8x128xf32>
    %cst = arith.constant 0.000000e+00 : f32
    %17 = vector.broadcast %cst : f32 to vector<8x128xf32>
    %18 = arith.maximumf %16, %17 : vector<8x128xf32>
    %c0_5 = arith.constant 0 : index
    %c0_6 = arith.constant 0 : index
    %19 = vector.load %arg4[%c0_5, %c0_6] : memref<128x128xf32, #tpu.memory_space<vmem>>, vector<128x128xf32>
    %cst_7 = arith.constant dense<0.000000e+00> : vector<8x128xf32>
    %20 = tpu.matmul %18, %19, %cst_7 {dimension_numbers = #tpu.dot_dimension_numbers<[1], [0], [0], [1], [0, 0, 1, 1], [], []>} : vector<8x128xf32>, vector<128x128xf32>, vector<8x128xf32> -> vector<8x128xf32>
    %c0_8 = arith.constant 0 : index
    %c0_9 = arith.constant 0 : index
    %21 = vector.load %arg5[%c0_8, %c0_9] : memref<1x128xf32, #tpu.memory_space<vmem>>, vector<1x128xf32>
    %22 = vector.broadcast %21 : vector<1x128xf32> to vector<8x128xf32>
    %23 = arith.addf %20, %22 : vector<8x128xf32>
    %cst_10 = arith.constant 0.000000e+00 : f32
    %24 = vector.broadcast %cst_10 : f32 to vector<8x128xf32>
    %25 = arith.maximumf %23, %24 : vector<8x128xf32>
    %c0_11 = arith.constant 0 : index
    %c0_12 = arith.constant 0 : index
    %26 = vector.load %arg6[%c0_11, %c0_12] : memref<128x128xf32, #tpu.memory_space<vmem>>, vector<128x128xf32>
    %cst_13 = arith.constant dense<0.000000e+00> : vector<8x128xf32>
    %27 = tpu.matmul %25, %26, %cst_13 {dimension_numbers = #tpu.dot_dimension_numbers<[1], [0], [0], [1], [0, 0, 1, 1], [], []>} : vector<8x128xf32>, vector<128x128xf32>, vector<8x128xf32> -> vector<8x128xf32>
    %c0_14 = arith.constant 0 : index
    %c0_15 = arith.constant 0 : index
    %28 = vector.load %arg7[%c0_14, %c0_15] : memref<1x128xf32, #tpu.memory_space<vmem>>, vector<1x128xf32>
    %29 = vector.broadcast %28 : vector<1x128xf32> to vector<8x128xf32>
    %30 = arith.addf %27, %29 : vector<8x128xf32>
    %31 = vector.extract_strided_slice %30 {offsets = [0, 0], sizes = [8, 3], strides = [1, 1]} : vector<8x128xf32> to vector<8x3xf32>
    %c0_16 = arith.constant 0 : index
    %c0_17 = arith.constant 0 : index
    %32 = vector.load %arg8[%c0_16, %c0_17] : memref<8x3xf32, #tpu.memory_space<vmem>>, vector<8x3xf32>
    tpu.vector_store %arg8[%c0_16, %c0_17], %31 {strides = array<i32>} : memref<8x3xf32, #tpu.memory_space<vmem>>, vector<8x3xf32>,
    return
  }
  func.func @transform_0(%arg0: i32) -> (i32, i32) {
    %c0_i32 = arith.constant 0 : i32
    %c0_i32_0 = arith.constant 0 : i32
    return %arg0, %c0_i32 : i32, i32
  }
  func.func @transform_1(%arg0: i32) -> (i32, i32) {
    %c0_i32 = arith.constant 0 : i32
    %c0_i32_0 = arith.constant 0 : i32
    %c0_i32_1 = arith.constant 0 : i32
    return %c0_i32, %c0_i32_0 : i32, i32
  }
  func.func @transform_2(%arg0: i32) -> (i32, i32) {
    %c0_i32 = arith.constant 0 : i32
    %c0_i32_0 = arith.constant 0 : i32
    %c0_i32_1 = arith.constant 0 : i32
    return %c0_i32, %c0_i32_0 : i32, i32
  }
  func.func @transform_3(%arg0: i32) -> (i32, i32) {
    %c0_i32 = arith.constant 0 : i32
    %c0_i32_0 = arith.constant 0 : i32
    %c0_i32_1 = arith.constant 0 : i32
    return %c0_i32, %c0_i32_0 : i32, i32
  }
  func.func @transform_4(%arg0: i32) -> (i32, i32) {
    %c0_i32 = arith.constant 0 : i32
    %c0_i32_0 = arith.constant 0 : i32
    %c0_i32_1 = arith.constant 0 : i32
    return %c0_i32, %c0_i32_0 : i32, i32
  }
  func.func @transform_5(%arg0: i32) -> (i32, i32) {
    %c0_i32 = arith.constant 0 : i32
    %c0_i32_0 = arith.constant 0 : i32
    %c0_i32_1 = arith.constant 0 : i32
    return %c0_i32, %c0_i32_0 : i32, i32
  }
  func.func @transform_6(%arg0: i32) -> (i32, i32) {
    %c0_i32 = arith.constant 0 : i32
    %c0_i32_0 = arith.constant 0 : i32
    %c0_i32_1 = arith.constant 0 : i32
    return %c0_i32, %c0_i32_0 : i32, i32
  }
  func.func @transform_7(%arg0: i32) -> (i32, i32) {
    %c0_i32 = arith.constant 0 : i32
    %c0_i32_0 = arith.constant 0 : i32
    return %arg0, %c0_i32 : i32, i32
  }
}

</mosaic_0001>

<bundles_post_ra>
// kernel: tpu_custom_call.1
= control target key start
LH: loop header
LB: loop body
LE: loop exit
PB: predicated region body
PF: predicated region fallthrough
CT: control target
= control target key end

     0   :  { %12 = vsyncpa [#allocation3], 0  ;;  %s547_s0 = inlined_call_operand.vmem [shape: f32[8,2], index: 0, kind: input, shape index: {}]   ;;  %s548_s1 = inlined_call_operand.vmem [shape: f32[2,128], index: 1, kind: input, shape index: {}]   ;;  %s549_s2 = inlined_call_operand.vmem [shape: f32[1,128], index: 2, kind: input, shape index: {}]   ;;  %s550_s3 = inlined_call_operand.hbm [shape: f32[128,128], index: 3, kind: input, shape index: {}]   ;;  %s551_s4 = inlined_call_operand.vmem [shape: f32[1,128], index: 4, kind: input, shape index: {}]   ;;  %s552_s5 = inlined_call_operand.hbm [shape: f32[128,128], index: 5, kind: input, shape index: {}]   ;;  %s553_s6 = inlined_call_operand.vmem [shape: f32[1,128], index: 6, kind: input, shape index: {}]   ;;  %s554_s7 = inlined_call_operand.vmem [shape: f32[8,3], index: 7, kind: output, shape index: {}]  }
   0x1   :  { %13 = vsyncpa [#allocation5], 0  ;;  %s441_s24 = smov [#allocation2]  }
   0x2   :  { %s25_s25 = sshll.u32 %s441_s24, 4  ;;  %s26_s25 = int_to_ptr.vmem [resolvable:$true] %s25_s25 }
   0x3   :  { %s405_s26 = scalar_lea.vmem %s26_s25, 2048  ;;  %p410_p1 = scmp.lt.s32.totalorder %s26_s25, %s26_s25 }
   0x4   :  { %p406_p0 = scmp.ne.s32.totalorder %s26_s25, %s405_s26  ;;  %p411_p2 = scmp.lt.s32.totalorder %s405_s26, %s405_s26 }
   0x6   :  { %p412_p3 = por %p411_p2, %p410_p1 }
   0x8   :  { %p413_p4 = pnand %p412_p3, %p406_p0 }
   0xa   :  { %416 = shalt.err (!%p413_p4)
}
   0xb   :  { %s442_s27 = smov 128   ;;  %s443_s28 = smov 8  }
   0xc   :  { %31 = dma.hbm_to_vmem [thread:$0]  %s550_s3, 2048, %s26_s25, [#allocation3], %s442_s27, %s442_s27, %s443_s28  }
   0xd   :  { %s444_s8 = smov [#allocation4]  }
   0xe   :  { %s39_s9 = sshll.u32 %s444_s8, 4  ;;  %s40_s9 = int_to_ptr.vmem [resolvable:$true] %s39_s9 }
   0xf   :  { %s425_s10 = scalar_lea.vmem %s40_s9, 2048  ;;  %p430_p6 = scmp.lt.s32.totalorder %s40_s9, %s40_s9 }
  0x10   :  { %p426_p5 = scmp.ne.s32.totalorder %s40_s9, %s425_s10  ;;  %p431_p7 = scmp.lt.s32.totalorder %s425_s10, %s425_s10 }
  0x12   :  { %p432_p8 = por %p431_p7, %p430_p6 }
  0x14   :  { %p433_p9 = pnand %p432_p8, %p426_p5 }
  0x16   :  { %436 = shalt.err (!%p433_p9)
}
  0x17   :  { %45 = dma.hbm_to_vmem [thread:$0]  %s552_s5, 2048, %s40_s9, [#allocation5], %s442_s27, %s442_s27, %s443_s28  }
  0x18   :  { %437 = dma.done.wait [#allocation3], 2048  }
  0x19   :  { %438 = vsyncadd [#allocation3], 4294965248 }
  0x1a   :  { %439 = dma.done.wait [#allocation5], 2048  }
  0x1b   :  { %440 = vsyncadd [#allocation5], 4294965248  ;;  %v445_v0 = vmov 0   ;;  %v446_v1 = vmov 0.0   ;;  %v54_v2 = vld [vmem:[%s547_s0] sm:$0xff]  ;;  %v100_v3 = vld [vmem:[#allocation2 + $0x78] sm:$0xff]  ;;  %v68_v33 = vlaneseq }
  0x1c   :  { %395 = vset.pattern.permute.xlu0 %v445_v0  ;;  %317 = vmatprep.subr.mxu0 %v446_v1  ;;  %v99_v4 = vld [vmem:[#allocation2 + $0x70] sm:$0xff]  ;;  %v98_v5 = vld [vmem:[#allocation2 + $0x68] sm:$0xff]  ;;  %v97_v6 = vld [vmem:[#allocation2 + $0x60] sm:$0xff]  ;;  %v447_v7 = vmov 1   ;;  %vm448_vm0 = vmmov 0   ;;  %vm272_vm1 = vcmask 23552  }
  0x1d   :  { %352 = vmatprep.subr.mxu1 %v446_v1  ;;  %65 = vperm.xlu0 %395, %v54_v2   ;;  %v96_v8 = vld [vmem:[#allocation2 + $0x58] sm:$0xff]  ;;  %v95_v9 = vld [vmem:[#allocation2 + $0x50] sm:$0xff]  ;;  %v94_v12 = vld [vmem:[#allocation2 + $0x48] sm:$0xff]  ;;  %v69_v34 = vshrl.u32 %v68_v33, 7 }
  0x1e   :  { %318 = vmatpush3.msra.mxu0 %v100_v3  ;;  %349 = vmatprep.mubr.msk.f32.mxu0 %vm448_vm0, %v446_v1  ;;  %v194_v10 = vld [vmem:[#allocation4 + $0x78] sm:$0xff]  ;;  %v193_v11 = vld [vmem:[#allocation4 + $0x70] sm:$0xff]  ;;  %v192_v13 = vld [vmem:[#allocation4 + $0x68] sm:$0xff] }
  0x1f   :  { %319 = vmatprep.subr.mxu0 %v446_v1  ;;  %384 = vmatprep.mubr.msk.f32.mxu1 %vm448_vm0, %v446_v1  ;;  %v93_v14 = vld [vmem:[#allocation2 + $0x40] sm:$0xff]  ;;  %v92_v16 = vld [vmem:[#allocation2 + $0x38] sm:$0xff]  ;;  %v91_v18 = vld [vmem:[#allocation2 + $0x30] sm:$0xff]  ;;  %v70_v35 = vsub.s32 0, %v69_v34  ;;  %v80_v38 = vsub.s32 1, %v69_v34 }
  0x20   :  { %320 = vmatpush3.msra.mxu0 %v99_v4  ;;  %353 = vmatpush3.msra.mxu1 %v194_v10  ;;  %v191_v15 = vld [vmem:[#allocation4 + $0x60] sm:$0xff]  ;;  %v190_v17 = vld [vmem:[#allocation4 + $0x58] sm:$0xff]  ;;  %v189_v19 = vld [vmem:[#allocation4 + $0x50] sm:$0xff] }
  0x21   :  { %321 = vmatprep.subr.mxu0 %v446_v1  ;;  %396 = vset.pattern.permute.xlu0 %v447_v7  ;;  %v90_v20 = vld [vmem:[#allocation2 + $0x28] sm:$0xff]  ;;  %v89_v22 = vld [vmem:[#allocation2 + $0x20] sm:$0xff]  ;;  %v88_v24 = vld [vmem:[#allocation2 + $0x18] sm:$0xff] }
  0x22   :  { %322 = vmatpush3.msra.mxu0 %v98_v5  ;;  %75 = vperm.xlu0 %396, %v54_v2   ;;  %v188_v21 = vld [vmem:[#allocation4 + $0x48] sm:$0xff]  ;;  %v187_v23 = vld [vmem:[#allocation4 + $0x40] sm:$0xff]  ;;  %v186_v25 = vld [vmem:[#allocation4 + $0x38] sm:$0xff] }
  0x23   :  { %323 = vmatprep.subr.mxu0 %v446_v1  ;;  %354 = vmatprep.subr.mxu1 %v446_v1  ;;  %v87_v26 = vld [vmem:[#allocation2 + $0x10] sm:$0xff]  ;;  %v86_v28 = vld [vmem:[#allocation2 + $0x8] sm:$0xff]  ;;  %v85_v30 = vld [vmem:[#allocation2] sm:$0xff] }
  0x24   :  { %324 = vmatpush3.msra.mxu0 %v97_v6  ;;  %355 = vmatpush3.msra.mxu1 %v193_v11  ;;  %v185_v27 = vld [vmem:[#allocation4 + $0x30] sm:$0xff]  ;;  %v184_v29 = vld [vmem:[#allocation4 + $0x28] sm:$0xff]  ;;  %v183_v31 = vld [vmem:[#allocation4 + $0x20] sm:$0xff] }
  0x25   :  { %325 = vmatprep.subr.mxu0 %v446_v1  ;;  %356 = vmatprep.subr.mxu1 %v446_v1  ;;  %v182_v32 = vld [vmem:[#allocation4 + $0x18] sm:$0xff]  ;;  %v55_v36 = vld [vmem:[%s548_s1] sm:$0x3]  ;;  %v181_v48 = vld [vmem:[#allocation4 + $0x10] sm:$0xff] }
  0x26   :  { %326 = vmatpush3.msra.mxu0 %v96_v8  ;;  %357 = vmatpush3.msra.mxu1 %v192_v13  ;;  %v71_v37 = vrot.slane %v55_v36, %v70_v35  ;;  %v81_v41 = vrot.slane %v55_v36, %v80_v38  ;;  %v280_v42 = vld [vmem:[%s549_s2] ss:$0 sm:$0xff]  ;;  %v180_v49 = vld [vmem:[#allocation4 + $0x8] sm:$0xff] }
  0x27   :  { %327 = vmatprep.subr.mxu0 %v446_v1  ;;  %358 = vmatprep.subr.mxu1 %v446_v1  ;;  %v179_v50 = vld [vmem:[#allocation4] sm:$0xff] }
  0x28   :  { %328 = vmatpush3.msra.mxu0 %v95_v9  ;;  %359 = vmatpush3.msra.mxu1 %v191_v15  ;;  %v281_v51 = vld [vmem:[%s551_s4] ss:$0 sm:$0xff] }
  0x29   :  { %329 = vmatprep.subr.mxu0 %v446_v1  ;;  %360 = vmatprep.subr.mxu1 %v446_v1  ;;  %v282_v56 = vld [vmem:[%s553_s6] ss:$0 sm:$0xff] }
  0x2a   :  { %330 = vmatpush3.msra.mxu0 %v94_v12  ;;  %361 = vmatpush3.msra.mxu1 %v190_v17 }
  0x2b   :  { %331 = vmatprep.subr.mxu0 %v446_v1  ;;  %362 = vmatprep.subr.mxu1 %v446_v1 }
  0x2c   :  { %332 = vmatpush3.msra.mxu0 %v93_v14  ;;  %363 = vmatpush3.msra.mxu1 %v189_v19 }
  0x2d   :  { %333 = vmatprep.subr.mxu0 %v446_v1  ;;  %364 = vmatprep.subr.mxu1 %v446_v1 }
  0x2e   :  { %334 = vmatpush3.msra.mxu0 %v92_v16  ;;  %365 = vmatpush3.msra.mxu1 %v188_v21 }
  0x2f   :  { %335 = vmatprep.subr.mxu0 %v446_v1  ;;  %366 = vmatprep.subr.mxu1 %v446_v1 }
  0x30   :  { %336 = vmatpush3.msra.mxu0 %v91_v18  ;;  %367 = vmatpush3.msra.mxu1 %v187_v23 }
  0x31   :  { %337 = vmatprep.subr.mxu0 %v446_v1  ;;  %368 = vmatprep.subr.mxu1 %v446_v1 }
  0x32   :  { %338 = vmatpush3.msra.mxu0 %v90_v20  ;;  %369 = vmatpush3.msra.mxu1 %v186_v25 }
  0x33   :  { %339 = vmatprep.subr.mxu0 %v446_v1  ;;  %370 = vmatprep.subr.mxu1 %v446_v1 }
  0x34   :  { %340 = vmatpush3.msra.mxu0 %v89_v22  ;;  %371 = vmatpush3.msra.mxu1 %v185_v27 }
  0x35   :  { %341 = vmatprep.subr.mxu0 %v446_v1  ;;  %372 = vmatprep.subr.mxu1 %v446_v1 }
  0x36   :  { %342 = vmatpush3.msra.mxu0 %v88_v24  ;;  %373 = vmatpush3.msra.mxu1 %v184_v29 }
  0x37   :  { %343 = vmatprep.subr.mxu0 %v446_v1  ;;  %374 = vmatprep.subr.mxu1 %v446_v1 }
  0x38   :  { %344 = vmatpush3.msra.mxu0 %v87_v26  ;;  %375 = vmatpush3.msra.mxu1 %v183_v31 }
  0x39   :  { %345 = vmatprep.subr.mxu0 %v446_v1  ;;  %376 = vmatprep.subr.mxu1 %v446_v1 }
  0x3a   :  { %346 = vmatpush3.msra.mxu0 %v86_v28  ;;  %377 = vmatpush3.msra.mxu1 %v182_v32 }
  0x3b   :  { %347 = vmatprep.subr.mxu0 %v446_v1  ;;  %378 = vmatprep.subr.mxu1 %v446_v1 }
  0x3c   :  { %348 = vmatpush3.msra.mxu0 %v85_v30  ;;  %379 = vmatpush3.msra.mxu1 %v181_v48 }
  0x3d   :  { %380 = vmatprep.subr.mxu1 %v446_v1 }
  0x3e   :  { %381 = vmatpush3.msra.mxu1 %v180_v49 }
  0x3f   :  { %382 = vmatprep.subr.mxu1 %v446_v1 }
  0x40   :  { %383 = vmatpush3.msra.mxu1 %v179_v50 }
  0x98   :  { %v66_v39 = vpop.permute.xlu0 %65 }
  0x99   :  { %v72_v40 = vmul.f32 %v71_v37, %v66_v39 }
  0x9b   :  { %v73_v44 = vadd.f32 %v280_v42, %v72_v40 }
  0x9d   :  { %v76_v43 = vpop.permute.xlu0 %75 }
  0x9e   :  { %v82_v45 = vmul.f32 %v81_v41, %v76_v43 }
  0xa0   :  { %v83_v46 = vadd.f32 %v82_v45, %v73_v44 }
  0xa2   :  { %v84_v47 = vmax.f32 %v83_v46, 0.0 }
  0xa4   :  { %350 = vmatmul.mubr.f32.vlgmr.msra.gmra.mxu0 %v84_v47 }
 0x164   :  { %v174_v52 = vpop.f32.mrf.mxu0 }
 0x165   :  { %v175_v53 = vadd.f32 %v281_v51, %v174_v52 }
 0x166   :  { %v351_v54 = vpop.f32.mrf.mxu0 }
 0x167   :  { %v178_v55 = vmax.f32 %v175_v53, 0.0 }
 0x169   :  { %385 = vmatmul.mubr.f32.vlgmr.msra.gmra.mxu1 %v178_v55 }
 0x229   :  { %v268_v57 = vpop.f32.mrf.mxu1 }
 0x22a   :  { %v269_v58 = vadd.f32 %v282_v56, %v268_v57 }
 0x22b   :  { %v386_v59 = vpop.f32.mrf.mxu1 }
 0x22c   :  { %273 = vst.msk [vmem:[%s554_s7] sm:$0xff] %vm272_vm1, %v269_v58 }
 0x22d   :  { %278 = vsyncpa [#allocation3], 1 }
 0x22e   :  { %279 = vsyncpa [#allocation5], 1 }

</bundles_post_ra>
